<compile_context>
chip_gen: v6e
topology: v6e:2x2x1
jax: 0.10.0
libtpu: 0.0.40
codegen_flags: <defaults>
</compile_context>

<pallas_src>
import functools

import jax
import jax.numpy as jnp
from jax.experimental import pallas as pl
from jax.experimental.pallas import tpu as pltpu


def _chan_ln_kernel(x_ref, g_ref, o_ref, *, eps):
    # x_ref: (1, C, TILE_S) ; g_ref: (C, 1) ; o_ref: (1, C, TILE_S)
    x = x_ref[0].astype(jnp.float32)                              # (C, TILE_S)
    mean = jnp.mean(x, axis=0, keepdims=True)                     # (1, TILE_S)
    centered = x - mean
    var = jnp.mean(centered * centered, axis=0, keepdims=True)    # unbiased=False
    inv = jax.lax.rsqrt(jnp.maximum(var, eps))                    # == var.clamp(min=eps).rsqrt()
    g = g_ref[...].astype(jnp.float32)                            # (C, 1) broadcasts over lanes
    o_ref[0] = (centered * inv * g).astype(o_ref.dtype)


def _pick_tile(s_pad, c, itemsize, max_block_bytes=2 << 20):
    # Largest lane tile (multiple of 128) that divides the padded spatial size
    # and keeps a single block <= ~2 MiB (so 2 inputs-outputs x 2 buffers stays
    # well under the scoped-VMEM default on v5e/v6e/v7x).
    for t in (2048, 1024, 512, 256, 128):
        if s_pad % t == 0 and c * t * itemsize <= max_block_bytes:
            return t
    return 128


def chan_layer_norm_pallas(x, g):
    """x: (B, C, T, H, W); g: (C,)  (== torch parameter of shape (C, 1, 1, 1))."""
    B, C, T, H, W = x.shape
    S = T * H * W
    eps = 1e-5 if x.dtype == jnp.float32 else 1e-3

    x_flat = x.reshape(B, C, S)
    s_pad = ((S + 127) // 128) * 128
    if s_pad != S:
        x_flat = jnp.pad(x_flat, ((0, 0), (0, 0), (0, s_pad - S)))

    tile = _pick_tile(s_pad, C, x.dtype.itemsize)
    g2 = g.reshape(C, 1).astype(x.dtype)

    out = pl.pallas_call(
        functools.partial(_chan_ln_kernel, eps=eps),
        out_shape=jax.ShapeDtypeStruct((B, C, s_pad), x.dtype),
        grid=(B, s_pad // tile),
        in_specs=[
            pl.BlockSpec((1, C, tile), lambda b, s: (b, 0, s)),
            pl.BlockSpec((C, 1), lambda b, s: (0, 0)),
        ],
        out_specs=pl.BlockSpec((1, C, tile), lambda b, s: (b, 0, s)),
        compiler_params=pltpu.CompilerParams(
            dimension_semantics=("parallel", "parallel")),
    )(x_flat, g2)

    return out[:, :, :S].reshape(B, C, T, H, W)


def chan_layer_norm_ref(x, g):
    # Plain-JAX reference mirroring the PyTorch module (NCDHW, reduce over dim=1).
    eps = 1e-5 if x.dtype == jnp.float32 else 1e-3
    mean = jnp.mean(x, axis=1, keepdims=True)
    var = jnp.mean((x - mean) ** 2, axis=1, keepdims=True)
    return (x - mean) * jax.lax.rsqrt(jnp.maximum(var, eps)) * g.reshape(1, -1, 1, 1, 1)


if __name__ == "__main__":
    key = jax.random.PRNGKey(0)
    # Small NCDHW shapes; S = T*H*W = 168 exercises the pad-to-128-lanes path.
    B, C, T, H, W = 2, 32, 4, 6, 7
    k1, k2 = jax.random.split(key)
    x = jax.random.normal(k1, (B, C, T, H, W), jnp.float32)
    g = 1.0 + 0.1 * jax.random.normal(k2, (C,), jnp.float32)

    out = jax.block_until_ready(chan_layer_norm_pallas(x, g))
    ref = chan_layer_norm_ref(x, g)

    assert out.shape == x.shape
    max_err = float(jnp.max(jnp.abs(out - ref)))
    assert jnp.allclose(out, ref, atol=1e-4, rtol=1e-4), max_err
    print("KERNEL_OK")
</pallas_src>

<mosaic_0001>
module attributes {stable_mosaic.version = 11 : i64} {
  func.func @_chan_ln_kernel(%arg0: i32, %arg1: i32, %arg2: memref<1x32x256xf32, #tpu.memory_space<vmem>>, %arg3: memref<32x1xf32, #tpu.memory_space<vmem>>, %arg4: memref<1x32x256xf32, #tpu.memory_space<vmem>>) attributes {dimension_semantics = [#tpu.dimension_semantics<parallel>, #tpu.dimension_semantics<parallel>], iteration_bounds = array<i64: 2, 1>, scalar_prefetch = 0 : i64, scratch_operands = 0 : i64, tpu.core_type = #tpu.core_type<tc>, window_params = [{transform_indices = @transform_0, window_bounds = array<i64: 1, 32, 256>}, {pipeline_mode = #tpu.pipeline_mode<synchronous>, transform_indices = @transform_1, window_bounds = array<i64: 32, 1>}, {transform_indices = @transform_2, window_bounds = array<i64: 1, 32, 256>}]} {
    %c0 = arith.constant 0 : index
    %c0_0 = arith.constant 0 : index
    %c0_1 = arith.constant 0 : index
    %0 = vector.load %arg2[%c0, %c0_0, %c0_1] : memref<1x32x256xf32, #tpu.memory_space<vmem>>, vector<1x32x256xf32>
    %1 = vector.shape_cast %0 : vector<1x32x256xf32> to vector<32x256xf32>
    %cst = arith.constant dense<0.000000e+00> : vector<256xf32>
    %2 = vector.multi_reduction <add>, %1, %cst [0] : vector<32x256xf32> to vector<256xf32>
    %3 = vector.shape_cast %2 : vector<256xf32> to vector<1x256xf32>
    %cst_2 = arith.constant 3.200000e+01 : f32
    %4 = vector.broadcast %cst_2 : f32 to vector<1x256xf32>
    %5 = arith.divf %3, %4 : vector<1x256xf32>
    %6 = vector.broadcast %5 : vector<1x256xf32> to vector<32x256xf32>
    %7 = arith.subf %1, %6 : vector<32x256xf32>
    %8 = arith.mulf %7, %7 : vector<32x256xf32>
    %cst_3 = arith.constant dense<0.000000e+00> : vector<256xf32>
    %9 = vector.multi_reduction <add>, %8, %cst_3 [0] : vector<32x256xf32> to vector<256xf32>
    %10 = vector.shape_cast %9 : vector<256xf32> to vector<1x256xf32>
    %cst_4 = arith.constant 3.200000e+01 : f32
    %11 = vector.broadcast %cst_4 : f32 to vector<1x256xf32>
    %12 = arith.divf %10, %11 : vector<1x256xf32>
    %cst_5 = arith.constant 9.99999974E-6 : f32
    %13 = vector.broadcast %cst_5 : f32 to vector<1x256xf32>
    %14 = arith.maximumf %12, %13 : vector<1x256xf32>
    %15 = math.rsqrt %14 : vector<1x256xf32>
    %c0_6 = arith.constant 0 : index
    %c0_7 = arith.constant 0 : index
    %16 = vector.load %arg3[%c0_6, %c0_7] : memref<32x1xf32, #tpu.memory_space<vmem>>, vector<32x1xf32>
    %17 = vector.broadcast %15 : vector<1x256xf32> to vector<32x256xf32>
    %18 = arith.mulf %7, %17 : vector<32x256xf32>
    %19 = vector.broadcast %16 : vector<32x1xf32> to vector<32x256xf32>
    %20 = arith.mulf %18, %19 : vector<32x256xf32>
    %c0_8 = arith.constant 0 : index
    %c0_9 = arith.constant 0 : index
    %c0_10 = arith.constant 0 : index
    %21 = vector.load %arg4[%c0_8, %c0_9, %c0_10] : memref<1x32x256xf32, #tpu.memory_space<vmem>>, vector<1x32x256xf32>
    %22 = vector.shape_cast %21 : vector<1x32x256xf32> to vector<32x256xf32>
    %23 = vector.shape_cast %20 : vector<32x256xf32> to vector<1x32x256xf32>
    tpu.vector_store %arg4[%c0_8, %c0_9, %c0_10], %23 {strides = array<i32>} : memref<1x32x256xf32, #tpu.memory_space<vmem>>, vector<1x32x256xf32>,
    return
  }
  func.func @transform_0(%arg0: i32, %arg1: i32) -> (i32, i32, i32) {
    %c0_i32 = arith.constant 0 : i32
    %c0_i32_0 = arith.constant 0 : i32
    return %arg0, %c0_i32, %arg1 : i32, i32, i32
  }
  func.func @transform_1(%arg0: i32, %arg1: i32) -> (i32, i32) {
    %c0_i32 = arith.constant 0 : i32
    %c0_i32_0 = arith.constant 0 : i32
    %c0_i32_1 = arith.constant 0 : i32
    return %c0_i32, %c0_i32_0 : i32, i32
  }
  func.func @transform_2(%arg0: i32, %arg1: i32) -> (i32, i32, i32) {
    %c0_i32 = arith.constant 0 : i32
    %c0_i32_0 = arith.constant 0 : i32
    return %arg0, %c0_i32, %arg1 : i32, i32, i32
  }
}

</mosaic_0001>

<bundles_post_ra>
// kernel: tpu_custom_call.1
= control target key start
LH: loop header
LB: loop body
LE: loop exit
PB: predicated region body
PF: predicated region fallthrough
CT: control target
= control target key end

     0   :  { %7 = vsyncpa [#allocation3], 0  ;;  %s786_s0 = inlined_call_operand.hbm [shape: f32[2,32,256], index: 0, kind: input, shape index: {}]   ;;  %s787_s1 = inlined_call_operand.vmem [shape: f32[32,1], index: 1, kind: input, shape index: {}]   ;;  %s788_s2 = inlined_call_operand.hbm [shape: f32[2,32,256], index: 2, kind: output, shape index: {}]  }
   0x1   :  { %9 = vsyncpa [#allocation3 + $0x1], 0 }
   0x2   :  { %10 = vsyncpa [#allocation4], 0 }
   0x3   :  { %12 = vsyncpa [#allocation4 + $0x1], 0  ;;  %s624_s9 = smov 0   ;;  %s626_s10 = smov 0  }
   0x4   :  { %s628_s11 = smov 0   ;;  %s630_s12 = smov 0  }
   0x5   :  { %s632_s13 = smov 0   ;;  %s634_s14 = smov 0  }
   0x6 LB: > { %s402_s15 = sadd.s32 4294967295, %s600_s14   ;;  %s403_s16 = sadd.s32 4294967294, %s600_s14   ;;  %s600_s14 = sphi %s634_s14, %s18_s14   ;;  %s596_s13 = sphi %s632_s13, %s799_s13   ;;  %s592_s12 = sphi %s630_s12, %s798_s12   ;;  %s588_s11 = sphi %s628_s11, %s797_s11   ;;  %s584_s10 = sphi %s626_s10, %s796_s10   ;;  %s580_s9 = sphi %s624_s9, %s795_s9  }
   0x7   : > { %s30_s17 = sadd.s32 1, %s596_s13  ;;  %s39_s18 = sadd.s32 1, %s588_s11 }
   0x8   : > { %p32_p0 = scmp.ge.s32.totalorder %s30_s17, 2  ;;  %p46_p1 = scmp.ne.s32.totalorder %s588_s11, %s584_s10 }
   0x9   : > { %p47_p2 = scmp.eq.s32.totalorder %s600_s14, 0  ;;  %p52_p3 = scmp.ne.s32.totalorder %s584_s10, %s580_s9 }
   0xa   : > { %s801_s17 = smov (%p32_p0, %s30_s17), 0  ;;  %p53_p5 = scmp.eq.s32.totalorder %s402_s15, 0 }
   0xb   : > { %p665_p4 = por %p47_p2, %p46_p1  ;;  %s34_s20 = ssub.s32 %s596_s13, %s801_s17 }
   0xc   : > { %p99_p6 = scmp.eq.s32.totalorder %s402_s15, 1  ;;  %p37_p7 = scmp.eq.s32.totalorder %s34_s20, 0 }
   0xd   : > { %p671_p8 = por %p53_p5, %p52_p3  ;;  %p105_p10 = scmp.eq.s32.totalorder %s403_s16, 1 }
   0xe   : > { %p675_p9 = por %p99_p6, %p46_p1  ;;  %p431_p13 = scmp.lt.s32.totalorder %s600_s14, 2 }
   0xf   : > { %s680_s23 = scalar_select %p37_p7, %s588_s11, %s39_s18  }
  0x10   : > { %p682_p11 = por %p105_p10, %p52_p3  ;;  %s128_s25 = sand.u32 1, %s588_s11  }
  0x11   : > { %s406_s26 = sshll.u32 %s128_s25, 6  ;;  %s417_s27 = sshll.u32 %s596_s13, 10 }
  0x12   : > { %s140_s30 = scalar_lea.hbm %s786_s0, %s417_s27  ;;  %s132_s3 = scalar_lea.vmem [#allocation2], %s406_s26 }
  0x13   : > { %s141_s4 = sshll.u32 %s132_s3, 4  ;;  %p695_p0 = pnand %p431_p13, %p665_p4  ;;  %s142_s4 = int_to_ptr.vmem [resolvable:$true] %s141_s4 }
  0x14   : > { %p409_p1 = scmp.ge.s32.totalorder %s600_s14, 1  ;;  %s129_s6 = scalar_lea.sflag [#allocation3], %s128_s25 }
  0x15   : > { %p494_p2 = pneg %p695_p0  ;;  %s505_s7 = scalar_lea.vmem %s142_s4, 1024 }
  0x16   : > { %p506_p3 = scmp.ne.s32.totalorder %s142_s4, %s505_s7  ;;  %s602_s8 = smov [#allocation2]  }
  0x17   : > { %s510_s15 = sshll.u32 %s602_s8, 4  ;;  %s511_s15 = int_to_ptr.vmem [resolvable:$false] %s510_s15 }
  0x18   : > { %p508_p5 = pnand %p506_p3, %p494_p2  ;;  %s512_s16 = scalar_lea.vmem %s511_s15, 2048 }
  0x19   : > { %p513_p7 = scmp.lt.s32.totalorder %s142_s4, %s511_s15  ;;  %p514_p10 = scmp.lt.s32.totalorder %s512_s16, %s505_s7 }
  0x1a   : > { %p509_p6 = pneg %p508_p5 }
  0x1b   : > { %p515_p12 = por %p514_p10, %p513_p7 }
  0x1d   : > { %p516_p4 = pnand %p515_p12, %p509_p6 }
  0x1f   : > { %519 = shalt.err (!%p516_p4)
}
  0x20   : > { %s603_s18 = smov 256   ;;  %s604_s19 = smov 16  }
  0x21   : > { %426 = dma.hbm_to_vmem [thread:$0]  (!%p695_p0), %s140_s30, 1024, %s142_s4, %s129_s6, %s603_s18, %s603_s18, %s604_s19  }
  0x22   : > { %p149_p13 = scmp.lt.s32.totalorder %s600_s14, 3 }
  0x24   : > { %p150_p2 = pnand %p409_p1, %p149_p13 }
  0x25   : > { %s708_s20 = sand.u32 (!%p150_p2), 1, %s584_s10  }
  0x26   : > { %153 = sbr.rel (%p150_p2) target bundleno = 191 (0xbf), region = 28  ;;  %s410_s25 = sshll.u32 (!%p150_p2), %s708_s20, 6 }
  0x27   : > { %s156_s26 = scalar_lea.sflag (!%p150_p2), [#allocation3], %s708_s20  ;;  %s159_s27 = scalar_lea.vmem (!%p150_p2), [#allocation2], %s410_s25 }
  0x2b   : > { %571 = dma.done.wait (%p671_p8), %s156_s26, 1024  }
  0x2c   : > { %573 = vsyncadd (%p671_p8), %s156_s26, 4294966272  ;;  %v605_v0 = vmov 0   ;;  %v253_v1 = vld [vmem:[%s787_s1 + $0x10] sm:$0xff]  ;;  %v251_v2 = vld [vmem:[%s787_s1] sm:$0xff]  ;;  %s179_s7 = scalar_lea.vmem [#allocation5], %s410_s25  ;;  %s418_s15 = sshll.u32 %s592_s12, 10 }
  0x2d   : > { %487 = vset.pattern.permute.xlu1 %v605_v0  ;;  %486 = vset.pattern.permute.xlu0 %v605_v0  ;;  %v254_v3 = vld [vmem:[%s787_s1 + $0x18] sm:$0xff]  ;;  %v252_v4 = vld [vmem:[%s787_s1 + $0x8] sm:$0xff]  ;;  %v182_v5 = vld [vmem:[%s159_s27] sm:$0xff]  ;;  %s315_s8 = sshll.u32 %s179_s7, 4  ;;  %s738_s19 = scalar_lea.hbm %s788_s2, %s418_s15  ;;  %s733_s8 = int_to_ptr.vmem [resolvable:$true] %s315_s8 }
  0x2e   : > { %275 = vperm.xlu1 %487, %v253_v1   ;;  %265 = vperm.xlu0 %486, %v251_v2   ;;  %v184_v6 = vld [vmem:[%s159_s27 + $0x10] sm:$0xff]  ;;  %v183_v7 = vld [vmem:[%s159_s27 + $0x8] sm:$0xff]  ;;  %v185_v8 = vld [vmem:[%s159_s27 + $0x18] sm:$0xff]  ;;  %s300_s12 = scalar_lea.sflag [#allocation4], %s708_s20  ;;  %s520_s25 = scalar_lea.vmem %s733_s8, 1024 }
  0x2f   : > { %v190_v9 = vadd.f32 %v184_v6, %v182_v5  ;;  %v186_v10 = vld [vmem:[%s159_s27 + $0x20] sm:$0xff]  ;;  %v199_v11 = vadd.f32 %v185_v8, %v183_v7  ;;  %v187_v12 = vld [vmem:[%s159_s27 + $0x28] sm:$0xff]  ;;  %v188_v14 = vld [vmem:[%s159_s27 + $0x30] sm:$0xff]  ;;  %p521_p8 = scmp.ne.s32.totalorder %s733_s8, %s520_s25  ;;  %s606_s26 = smov [#allocation5]  }
  0x30   : > { %v189_v16 = vld [vmem:[%s159_s27 + $0x38] sm:$0xff]  ;;  %s524_s27 = sshll.u32 %s606_s26, 4  ;;  %s525_s27 = int_to_ptr.vmem [resolvable:$false] %s524_s27 }
  0x31   : > { %v191_v13 = vadd.f32 %v190_v9, %v186_v10  ;;  %v200_v15 = vadd.f32 %v199_v11, %v187_v12  ;;  %p522_p12 = pnand %p521_p8, %p675_p9  ;;  %s526_s28 = scalar_lea.vmem %s525_s27, 2048 }
  0x32   : > { %280 = vperm.xlu1 %487, %v254_v3   ;;  %270 = vperm.xlu0 %486, %v252_v4   ;;  %p527_p1 = scmp.lt.s32.totalorder %s733_s8, %s525_s27  ;;  %p528_p3 = scmp.lt.s32.totalorder %s526_s28, %s520_s25 }
  0x33   : > { %v192_v17 = vadd.f32 %v191_v13, %v188_v14  ;;  %v201_v18 = vadd.f32 %v200_v15, %v189_v16  ;;  %p523_p0 = pneg %p522_p12 }
  0x34   : > { %p529_p5 = por %p528_p3, %p527_p1 }
  0x35   : > { %v193_v19 = vrot.slane %v192_v17, 4  ;;  %v202_v20 = vrot.slane %v201_v18, 4 }
  0x36   : > { %p530_p6 = pnand %p529_p5, %p523_p0 }
  0x37   : > { %v194_v21 = vadd.f32 %v193_v19, %v192_v17  ;;  %v203_v22 = vadd.f32 %v202_v20, %v201_v18 }
  0x39   : > { %v195_v23 = vrot.slane %v194_v21, 2  ;;  %v204_v24 = vrot.slane %v203_v22, 2 }
  0x3b   : > { %v196_v25 = vadd.f32 %v195_v23, %v194_v21  ;;  %v205_v26 = vadd.f32 %v204_v24, %v203_v22 }
  0x3d   : > { %v197_v27 = vrot.slane %v196_v25, 1  ;;  %v206_v28 = vrot.slane %v205_v26, 1 }
  0x3f   : > { %v198_v29 = vadd.f32 %v197_v27, %v196_v25  ;;  %v207_v30 = vadd.f32 %v206_v28, %v205_v26 }
  0x41   : > { %v209_v31 = vmul.f32 0.03125, %v198_v29  ;;  %v210_v32 = vmul.f32 0.03125, %v207_v30 }
  0x43   : > { %v211_v33 = vsub.f32 %v182_v5, %v209_v31  ;;  %v213_v34 = vsub.f32 %v184_v6, %v209_v31  ;;  %v212_v35 = vsub.f32 %v183_v7, %v210_v32  ;;  %v214_v36 = vsub.f32 %v185_v8, %v210_v32 }
  0x44   : > { %v215_v37 = vsub.f32 %v186_v10, %v209_v31  ;;  %v216_v40 = vsub.f32 %v187_v12, %v210_v32  ;;  %v217_v43 = vsub.f32 %v188_v14, %v209_v31  ;;  %v218_v46 = vsub.f32 %v189_v16, %v210_v32 }
  0x45   : > { %v219_v38 = vmul.f32 %v211_v33, %v211_v33  ;;  %v221_v39 = vmul.f32 %v213_v34, %v213_v34  ;;  %v220_v41 = vmul.f32 %v212_v35, %v212_v35  ;;  %v222_v42 = vmul.f32 %v214_v36, %v214_v36 }
  0x46   : > { %v223_v44 = vmul.f32 %v215_v37, %v215_v37  ;;  %v224_v47 = vmul.f32 %v216_v40, %v216_v40  ;;  %v225_v49 = vmul.f32 %v217_v43, %v217_v43  ;;  %v226_v51 = vmul.f32 %v218_v46, %v218_v46 }
  0x47   : > { %v227_v45 = vadd.f32 %v221_v39, %v219_v38  ;;  %v236_v48 = vadd.f32 %v222_v42, %v220_v41 }
  0x49   : > { %v228_v50 = vadd.f32 %v227_v45, %v223_v44  ;;  %v237_v52 = vadd.f32 %v236_v48, %v224_v47 }
  0x4b   : > { %v229_v53 = vadd.f32 %v228_v50, %v225_v49  ;;  %v238_v54 = vadd.f32 %v237_v52, %v226_v51 }
  0x4d   : > { %v230_v55 = vrot.slane %v229_v53, 4  ;;  %v239_v56 = vrot.slane %v238_v54, 4 }
  0x4f   : > { %v231_v57 = vadd.f32 %v230_v55, %v229_v53  ;;  %v240_v58 = vadd.f32 %v239_v56, %v238_v54 }
  0x51   : > { %v232_v59 = vrot.slane %v231_v57, 2  ;;  %v241_v60 = vrot.slane %v240_v58, 2 }
  0x53   : > { %v233_v61 = vadd.f32 %v232_v59, %v231_v57  ;;  %v242_v62 = vadd.f32 %v241_v60, %v240_v58 }
  0x55   : > { %v234_v63 = vrot.slane %v233_v61, 1  ;;  %v243_v0 = vrot.slane %v242_v62, 1 }
  0x57   : > { %v235_v1 = vadd.f32 %v234_v63, %v233_v61  ;;  %v244_v2 = vadd.f32 %v243_v0, %v242_v62 }
  0x59   : > { %v245_v3 = vmul.f32 0.03125, %v235_v1  ;;  %v246_v4 = vmul.f32 0.03125, %v244_v2 }
  0x5b   : > { %v247_v5 = vmax.f32 %v245_v3, 1e-05  ;;  %v248_v6 = vmax.f32 %v246_v4, 1e-05 }
  0x5d   : > { %488 = vrsqrt.f32 %v247_v5 }
  0x5e   : > { %490 = vrsqrt.f32 %v248_v6 }
  0x6a   : > { %v489_v7 = vpop.eup %488 }
  0x6b   : > { %v491_v8 = vpop.eup %490  ;;  %v259_v9 = vmul.f32 %v489_v7, %v215_v37  ;;  %v255_v11 = vmul.f32 %v489_v7, %v211_v33  ;;  %v261_v15 = vmul.f32 %v489_v7, %v217_v43  ;;  %v257_v17 = vmul.f32 %v489_v7, %v213_v34 }
  0x6c   : > { %v260_v10 = vmul.f32 %v491_v8, %v216_v40  ;;  %v256_v12 = vmul.f32 %v491_v8, %v212_v35  ;;  %v262_v16 = vmul.f32 %v491_v8, %v218_v46  ;;  %v258_v18 = vmul.f32 %v491_v8, %v214_v36 }
  0xa9   : > { %v276_v13 = vpop.permute.xlu1 %275  ;;  %v266_v14 = vpop.permute.xlu0 %265 }
  0xaa   : > { %v287_v19 = vmul.f32 %v276_v13, %v259_v9  ;;  %v288_v20 = vmul.f32 %v276_v13, %v260_v10  ;;  %v283_v21 = vmul.f32 %v266_v14, %v255_v11  ;;  %v284_v22 = vmul.f32 %v266_v14, %v256_v12 }
  0xac   : > { %295 = vst [vmem:[%s179_s7 + $0x20] sm:$0xff] %v287_v19  ;;  %296 = vst [vmem:[%s179_s7 + $0x28] sm:$0xff] %v288_v20 }
  0xad   : > { %291 = vst [vmem:[%s179_s7] sm:$0xff] %v283_v21  ;;  %292 = vst [vmem:[%s179_s7 + $0x8] sm:$0xff] %v284_v22  ;;  %v281_v23 = vpop.permute.xlu1 %280  ;;  %v271_v24 = vpop.permute.xlu0 %270 }
  0xae   : > { %v289_v25 = vmul.f32 %v281_v23, %v261_v15  ;;  %v290_v26 = vmul.f32 %v281_v23, %v262_v16  ;;  %v285_v27 = vmul.f32 %v271_v24, %v257_v17  ;;  %v286_v28 = vmul.f32 %v271_v24, %v258_v18 }
  0xb0   : > { %297 = vst [vmem:[%s179_s7 + $0x30] sm:$0xff] %v289_v25  ;;  %298 = vst [vmem:[%s179_s7 + $0x38] sm:$0xff] %v290_v26 }
  0xb1   : > { %293 = vst [vmem:[%s179_s7 + $0x10] sm:$0xff] %v285_v27  ;;  %294 = vst [vmem:[%s179_s7 + $0x18] sm:$0xff] %v286_v28 }
  0xb2   : > { %533 = shalt.err (!%p530_p6)
}
  0xb3   : > { %s534_s29 = scalar_lea.hbm %s738_s19, 1024  ;;  %s538_s4 = scalar_lea.hbm %s788_s2, 2048 }
  0xb4   : > { %p535_p7 = scmp.ne.s32.totalorder %s738_s19, %s534_s29  ;;  %p539_p13 = scmp.lt.s32.totalorder %s738_s19, %s788_s2 }
  0xb5   : > { %p540_p2 = scmp.lt.s32.totalorder %s538_s4, %s534_s29 }
  0xb6   : > { %p536_p10 = pnand %p535_p7, %p675_p9 }
  0xb7   : > { %p541_p8 = por %p540_p2, %p539_p13 }
  0xb8   : > { %p537_p4 = pneg %p536_p10 }
  0xba   : > { %p542_p12 = pnand %p541_p8, %p537_p4 }
  0xbc   : > { %545 = shalt.err (!%p542_p12)
}
  0xbd   : > { %s607_s21 = smov 256   ;;  %s608_s7 = smov 16  }
  0xbe   : > { %421 = dma.vmem_to_hbm [thread:$0]  (%p675_p9), %s733_s8, 1024, %s738_s19, %s300_s12, %s607_s21, %s607_s21, %s608_s7  }
  0xbf PF: > { %s330_s15 = sand.u32 1, %s580_s9   ;;  %p794_p0 = scmp.ge.s32.totalorder %s600_s14, 2 }
  0xc0   : > { %s331_s16 = scalar_lea.sflag [#allocation4], %s330_s15 }
  0xc1   : > { %p428_p1 = pnand %p794_p0, %p682_p11 }
  0xc3   : > { %p429_p3 = pneg %p428_p1 }
  0xc5   : > { %575 = dma.done.wait (%p429_p3), %s331_s16, 1024  }
  0xc6   : > { %577 = vsyncadd (%p429_p3), %s331_s16, 4294966272  ;;  %s18_s14 = sadd.s32 1, %s600_s14   ;;  %s795_s9 = smov %s584_s10 }
  0xc7   : > { %p15_p5 = scmp.ge.s32.totalorder %s18_s14, 4   ;;  %s796_s10 = smov %s588_s11 }
  0xc8   : > { %s797_s11 = smov %s680_s23  ;;  %s798_s12 = smov %s596_s13 }
  0xc9   : > { %s799_s13 = smov %s801_s17  ;;  %17 = sbr.rel (!%p15_p5) target bundleno = 6 (0x6), region = 73 }
  0xce   :  { %336 = vsyncpa [#allocation3], 1 }
  0xcf   :  { %338 = vsyncpa [#allocation3 + $0x1], 1 }
  0xd0   :  { %339 = vsyncpa [#allocation4], 1 }
  0xd1   :  { %341 = vsyncpa [#allocation4 + $0x1], 1 }

</bundles_post_ra>
